<compile_context>
chip_gen: v6e
topology: v6e:2x2x1
jax: 0.10.0
libtpu: 0.0.40
codegen_flags: <defaults>
</compile_context>

<pallas_src>
import math
from typing import Any, Callable, List

import jax
import jax.numpy as jnp
from jax.experimental import pallas as pl
from jax.experimental.pallas import tpu as pltpu


def _round_up(x: int, m: int) -> int:
    return ((x + m - 1) // m) * m


def _bucket_batch(batch: int) -> int:
    """Power-of-two bucket >= 8; avoids a fresh Mosaic compile per batch size."""
    return max(8, 1 << (max(batch, 1) - 1).bit_length())


def _make_fused_mlp_kernel(num_layers: int, in_dim: int, out_dim: int, P: int):
    """Fused sigmoid-MLP kernel.

    Refs:
      x_ref : (pbatch, in_dim)           raw input (lane-padded in-kernel)
      p_ref : (P + 8, num_layers * P)    packed params; layer i weight
                                         (pre-transposed [Fin,Fout], zero-
                                         padded) in [0:P, i*P:(i+1)*P],
                                         bias in row P of the same columns.
      o_ref : (pbatch, out_dim)
      h_ref : (pbatch, P)                VMEM scratch for padded activations
    """

    def kernel(x_ref, p_ref, o_ref, h_ref):
        # Build the lane-dense input activation in VMEM.  Padded lanes are
        # exactly zero, so they only ever hit zero weight rows.
        h_ref[...] = jnp.zeros_like(h_ref)
        h_ref[:, 0:in_dim] = x_ref[...].astype(jnp.float32)
        h = h_ref[...]

        for i in range(num_layers):
            w = p_ref[0:P, i * P:(i + 1) * P]        # (P, P)   static slice
            b = p_ref[P:P + 1, i * P:(i + 1) * P]    # (1, P)   static slice
            y = jnp.dot(h, w, preferred_element_type=jnp.float32) + b
            # sigmoid(y) = 0.5 * tanh(0.5 * y) + 0.5  (single EUP push,
            # no exp(-y) overflow, exact 0.5 at y == 0 for padded lanes).
            h = 0.5 * jnp.tanh(0.5 * y) + 0.5

        o_ref[...] = h[:, 0:out_dim].astype(o_ref.dtype)

    return kernel


class NetPallas:
    """JAX/Pallas port of the PyTorch Net MLP (single fused kernel forward)."""

    def __init__(
        self,
        structure: List[int],
        key: jax.Array,
        initializer: Callable[..., Any] = None,
    ):
        assert len(structure) >= 2
        self.structure = list(structure)
        self.layer_num = len(structure)
        self.num_layers = self.layer_num - 1
        self.in_dim = structure[0]
        self.out_dim = structure[-1]

        # One lane-dense padded feature width used by every layer.
        P = _round_up(max(structure), 128)
        self.P = P

        # Raw per-layer (w, b) in torch conventions, kept for the reference.
        self.layers: List = []
        # Packed parameter slab (invariant: padded rows/lanes are exactly 0).
        slab = jnp.zeros((P + 8, self.num_layers * P), jnp.float32)
        for i in range(self.num_layers):
            fan_in, fan_out = structure[i], structure[i + 1]
            key, kw, kb = jax.random.split(key, 3)
            # Weight: uniform(-1, 1) — the module's custom initializer.
            w = jax.random.uniform(
                kw, (fan_out, fan_in), minval=-1.0, maxval=1.0, dtype=jnp.float32
            )
            # Bias: nn.Linear default uniform(+-1/sqrt(fan_in)).
            bound = 1.0 / math.sqrt(fan_in)
            b = jax.random.uniform(
                kb, (fan_out,), minval=-bound, maxval=bound, dtype=jnp.float32
            )
            self.layers.append((w, b))
            slab = slab.at[0:fan_in, i * P:i * P + fan_out].set(w.T)
            slab = slab.at[P, i * P:i * P + fan_out].set(b)
        self.params_slab = slab

        self._kernel = _make_fused_mlp_kernel(
            self.num_layers, self.in_dim, self.out_dim, P
        )
        self._fwd = jax.jit(self._make_forward())

    def _make_forward(self):
        kernel = self._kernel
        P, in_dim, out_dim = self.P, self.in_dim, self.out_dim

        def fwd(x, slab):
            batch = x.shape[0]
            pbatch = _bucket_batch(batch)
            xp = x.astype(jnp.float32)
            if pbatch != batch:  # only when batch is not already a bucket size
                xp = jnp.zeros((pbatch, in_dim), jnp.float32).at[:batch].set(xp)

            vmem = pl.BlockSpec(memory_space=pltpu.MemorySpace.VMEM)
            out = pl.pallas_call(
                kernel,
                out_shape=jax.ShapeDtypeStruct((pbatch, out_dim), jnp.float32),
                in_specs=[vmem, vmem],
                out_specs=vmem,
                scratch_shapes=[pltpu.VMEM((pbatch, P), jnp.float32)],
            )(xp, slab)
            return out if pbatch == batch else out[:batch]

        return fwd

    def __call__(self, x: jax.Array) -> jax.Array:
        return self._fwd(x, self.params_slab)


def _reference_forward(x: jax.Array, layers) -> jax.Array:
    """Pure-JAX f32 reference (HIGHEST matmul precision), torch semantics."""
    h = x.astype(jnp.float32)
    for w, b in layers:
        y = jnp.dot(h, w.T, precision=jax.lax.Precision.HIGHEST) + b
        h = jax.nn.sigmoid(y)
    return h


if __name__ == "__main__":
    key = jax.random.PRNGKey(0)
    k_in, k_net = jax.random.split(key)

    # Classic XOR-style MLP: 2 -> 32 -> 32 -> 1, small batch.
    structure = [2, 32, 32, 1]
    batch = 8

    net = NetPallas(structure, k_net)
    x = jax.random.uniform(
        k_in, (batch, structure[0]), minval=0.0, maxval=1.0, dtype=jnp.float32
    )

    out = net(x)
    jax.block_until_ready(out)

    assert out.shape == (batch, structure[-1])
    assert bool(jnp.all(jnp.isfinite(out)))
    # Sigmoid range (tiny slack for the EUP tanh approximation).
    assert bool(jnp.all((out >= -1e-6) & (out <= 1.0 + 1e-6)))

    ref = _reference_forward(x, net.layers)
    err = float(jnp.max(jnp.abs(out - ref)))
    assert err < 2e-3, f"max abs err {err}"

    print("KERNEL_OK")
</pallas_src>

<mosaic_0001>
module attributes {stable_mosaic.version = 11 : i64} {
  func.func @kernel(%arg0: memref<8x2xf32, #tpu.memory_space<vmem>>, %arg1: memref<136x384xf32, #tpu.memory_space<vmem>>, %arg2: memref<8x1xf32, #tpu.memory_space<vmem>>, %arg3: memref<8x128xf32, #tpu.memory_space<vmem>>) attributes {dimension_semantics = [], scalar_prefetch = 0 : i64, scratch_operands = 1 : i64, tpu.core_type = #tpu.core_type<tc>} {
    %cst = arith.constant 0.000000e+00 : f32
    %0 = vector.broadcast %cst : f32 to vector<8x128xf32>
    %c0 = arith.constant 0 : index
    %c0_0 = arith.constant 0 : index
    %1 = vector.load %arg3[%c0, %c0_0] : memref<8x128xf32, #tpu.memory_space<vmem>>, vector<8x128xf32>
    tpu.vector_store %arg3[%c0, %c0_0], %0 {strides = array<i32>} : memref<8x128xf32, #tpu.memory_space<vmem>>, vector<8x128xf32>,
    %c0_1 = arith.constant 0 : index
    %c0_2 = arith.constant 0 : index
    %2 = vector.load %arg0[%c0_1, %c0_2] : memref<8x2xf32, #tpu.memory_space<vmem>>, vector<8x2xf32>
    %c0_3 = arith.constant 0 : index
    %c0_4 = arith.constant 0 : index
    %3 = vector.load %arg3[%c0_3, %c0_4] : memref<8x128xf32, #tpu.memory_space<vmem>>, vector<8x2xf32>
    tpu.vector_store %arg3[%c0_3, %c0_4], %2 {strides = array<i32>} : memref<8x128xf32, #tpu.memory_space<vmem>>, vector<8x2xf32>,
    %c0_5 = arith.constant 0 : index
    %c0_6 = arith.constant 0 : index
    %4 = vector.load %arg3[%c0_5, %c0_6] : memref<8x128xf32, #tpu.memory_space<vmem>>, vector<8x128xf32>
    %c0_7 = arith.constant 0 : index
    %c0_8 = arith.constant 0 : index
    %5 = vector.load %arg1[%c0_7, %c0_8] : memref<136x384xf32, #tpu.memory_space<vmem>>, vector<128x128xf32>
    %c128 = arith.constant 128 : index
    %c0_9 = arith.constant 0 : index
    %6 = vector.load %arg1[%c128, %c0_9] : memref<136x384xf32, #tpu.memory_space<vmem>>, vector<1x128xf32>
    %cst_10 = arith.constant dense<0.000000e+00> : vector<8x128xf32>
    %7 = tpu.matmul %4, %5, %cst_10 {dimension_numbers = #tpu.dot_dimension_numbers<[1], [0], [0], [1], [0, 0, 1, 1], [], []>} : vector<8x128xf32>, vector<128x128xf32>, vector<8x128xf32> -> vector<8x128xf32>
    %8 = vector.broadcast %6 : vector<1x128xf32> to vector<8x128xf32>
    %9 = arith.addf %7, %8 : vector<8x128xf32>
    %cst_11 = arith.constant 5.000000e-01 : f32
    %10 = vector.broadcast %cst_11 : f32 to vector<8x128xf32>
    %11 = arith.mulf %10, %9 : vector<8x128xf32>
    %12 = math.tanh %11 : vector<8x128xf32>
    %cst_12 = arith.constant 5.000000e-01 : f32
    %13 = vector.broadcast %cst_12 : f32 to vector<8x128xf32>
    %14 = arith.mulf %13, %12 : vector<8x128xf32>
    %cst_13 = arith.constant 5.000000e-01 : f32
    %15 = vector.broadcast %cst_13 : f32 to vector<8x128xf32>
    %16 = arith.addf %14, %15 : vector<8x128xf32>
    %c0_14 = arith.constant 0 : index
    %c128_15 = arith.constant 128 : index
    %17 = vector.load %arg1[%c0_14, %c128_15] : memref<136x384xf32, #tpu.memory_space<vmem>>, vector<128x128xf32>
    %c128_16 = arith.constant 128 : index
    %c128_17 = arith.constant 128 : index
    %18 = vector.load %arg1[%c128_16, %c128_17] : memref<136x384xf32, #tpu.memory_space<vmem>>, vector<1x128xf32>
    %cst_18 = arith.constant dense<0.000000e+00> : vector<8x128xf32>
    %19 = tpu.matmul %16, %17, %cst_18 {dimension_numbers = #tpu.dot_dimension_numbers<[1], [0], [0], [1], [0, 0, 1, 1], [], []>} : vector<8x128xf32>, vector<128x128xf32>, vector<8x128xf32> -> vector<8x128xf32>
    %20 = vector.broadcast %18 : vector<1x128xf32> to vector<8x128xf32>
    %21 = arith.addf %19, %20 : vector<8x128xf32>
    %cst_19 = arith.constant 5.000000e-01 : f32
    %22 = vector.broadcast %cst_19 : f32 to vector<8x128xf32>
    %23 = arith.mulf %22, %21 : vector<8x128xf32>
    %24 = math.tanh %23 : vector<8x128xf32>
    %cst_20 = arith.constant 5.000000e-01 : f32
    %25 = vector.broadcast %cst_20 : f32 to vector<8x128xf32>
    %26 = arith.mulf %25, %24 : vector<8x128xf32>
    %cst_21 = arith.constant 5.000000e-01 : f32
    %27 = vector.broadcast %cst_21 : f32 to vector<8x128xf32>
    %28 = arith.addf %26, %27 : vector<8x128xf32>
    %c0_22 = arith.constant 0 : index
    %c256 = arith.constant 256 : index
    %29 = vector.load %arg1[%c0_22, %c256] : memref<136x384xf32, #tpu.memory_space<vmem>>, vector<128x128xf32>
    %c128_23 = arith.constant 128 : index
    %c256_24 = arith.constant 256 : index
    %30 = vector.load %arg1[%c128_23, %c256_24] : memref<136x384xf32, #tpu.memory_space<vmem>>, vector<1x128xf32>
    %cst_25 = arith.constant dense<0.000000e+00> : vector<8x128xf32>
    %31 = tpu.matmul %28, %29, %cst_25 {dimension_numbers = #tpu.dot_dimension_numbers<[1], [0], [0], [1], [0, 0, 1, 1], [], []>} : vector<8x128xf32>, vector<128x128xf32>, vector<8x128xf32> -> vector<8x128xf32>
    %32 = vector.broadcast %30 : vector<1x128xf32> to vector<8x128xf32>
    %33 = arith.addf %31, %32 : vector<8x128xf32>
    %cst_26 = arith.constant 5.000000e-01 : f32
    %34 = vector.broadcast %cst_26 : f32 to vector<8x128xf32>
    %35 = arith.mulf %34, %33 : vector<8x128xf32>
    %36 = math.tanh %35 : vector<8x128xf32>
    %cst_27 = arith.constant 5.000000e-01 : f32
    %37 = vector.broadcast %cst_27 : f32 to vector<8x128xf32>
    %38 = arith.mulf %37, %36 : vector<8x128xf32>
    %cst_28 = arith.constant 5.000000e-01 : f32
    %39 = vector.broadcast %cst_28 : f32 to vector<8x128xf32>
    %40 = arith.addf %38, %39 : vector<8x128xf32>
    %41 = vector.extract_strided_slice %40 {offsets = [0, 0], sizes = [8, 1], strides = [1, 1]} : vector<8x128xf32> to vector<8x1xf32>
    %c0_29 = arith.constant 0 : index
    %c0_30 = arith.constant 0 : index
    %42 = vector.load %arg2[%c0_29, %c0_30] : memref<8x1xf32, #tpu.memory_space<vmem>>, vector<8x1xf32>
    tpu.vector_store %arg2[%c0_29, %c0_30], %41 {strides = array<i32>} : memref<8x1xf32, #tpu.memory_space<vmem>>, vector<8x1xf32>,
    return
  }
}

</mosaic_0001>

<bundles_post_ra>
// kernel: fwd.1
= control target key start
LH: loop header
LB: loop body
LE: loop exit
PB: predicated region body
PF: predicated region fallthrough
CT: control target
= control target key end

     0   :  { %7 = vsyncpa [#allocation4], 0  ;;  %s499_s9 = smov [#allocation3]   ;;  %s583_s0 = inlined_call_operand.vmem [shape: f32[8,2], index: 0, kind: input, shape index: {}]   ;;  %s584_s1 = inlined_call_operand.hbm [shape: f32[136,384], index: 1, kind: input, shape index: {}]   ;;  %s585_s2 = inlined_call_operand.vmem [shape: f32[8,1], index: 2, kind: output, shape index: {}]  }
   0x1   :  { %s15_s10 = sshll.u32 %s499_s9, 4  ;;  %s16_s10 = int_to_ptr.vmem [resolvable:$true] %s15_s10 }
   0x2   :  { %s485_s11 = scalar_lea.vmem %s16_s10, 6528  ;;  %p490_p1 = scmp.lt.s32.totalorder %s16_s10, %s16_s10 }
   0x3   :  { %p486_p0 = scmp.ne.s32.totalorder %s16_s10, %s485_s11  ;;  %p491_p2 = scmp.lt.s32.totalorder %s485_s11, %s485_s11 }
   0x5   :  { %p492_p3 = por %p491_p2, %p490_p1 }
   0x7   :  { %p493_p4 = pnand %p492_p3, %p486_p0 }
   0x9   :  { %496 = shalt.err (!%p493_p4)
}
   0xa   :  { %s500_s12 = smov 384   ;;  %s501_s13 = smov 24  }
   0xb   :  { %21 = dma.hbm_to_vmem [thread:$0]  %s584_s1, 6528, %s16_s10, [#allocation4], %s500_s12, %s500_s12, %s501_s13  }
   0xc   :  { %497 = dma.done.wait [#allocation4], 6528  }
   0xd   :  { %498 = vsyncadd [#allocation4], 4294960768  ;;  %v502_v0 = vmov 0.0   ;;  %vm503_vm0 = vmmov 0   ;;  %v45_v1 = vld [vmem:[#allocation3 + $0x168] sm:$0xff]  ;;  %v44_v2 = vld [vmem:[#allocation3 + $0x150] sm:$0xff] }
   0xe   :  { %361 = vmatprep.subr.mxu0 %v502_v0  ;;  %25 = vst [vmem:[#allocation2] sm:$0xff] %v502_v0  ;;  %393 = vmatprep.mubr.msk.f32.mxu0 %vm503_vm0, %v502_v0  ;;  %v43_v3 = vld [vmem:[#allocation3 + $0x138] sm:$0xff]  ;;  %vm27_vm1 = vcmask 15360   ;;  %v42_v4 = vld [vmem:[#allocation3 + $0x120] sm:$0xff]  ;;  %v136_v6 = vld [vmem:[#allocation3 + $0x170] sm:$0xff]  ;;  %vm303_vm2 = vcmask 7168  }
   0xf   :  { %396 = vmatprep.subr.mxu1 %v502_v0  ;;  %428 = vmatprep.mubr.msk.f32.mxu1 %vm503_vm0, %v502_v0  ;;  %v26_v5 = vld [vmem:[%s583_s0] sm:$0xff]  ;;  %v41_v7 = vld [vmem:[#allocation3 + $0x108] sm:$0xff]  ;;  %v134_v9 = vld [vmem:[#allocation3 + $0x140] sm:$0xff] }
  0x10   :  { %362 = vmatpush3.msra.mxu0 %v45_v1  ;;  %28 = vst.msk [vmem:[#allocation2] sm:$0xff] %vm27_vm1, %v26_v5  ;;  %397 = vmatpush3.msra.mxu1 %v136_v6  ;;  %v135_v8 = vld [vmem:[#allocation3 + $0x158] sm:$0xff]  ;;  %v40_v10 = vld [vmem:[#allocation3 + $0xf0] sm:$0xff]  ;;  %v133_v11 = vld [vmem:[#allocation3 + $0x128] sm:$0xff] }
  0x11   :  { %363 = vmatprep.subr.mxu0 %v502_v0  ;;  %398 = vmatprep.subr.mxu1 %v502_v0  ;;  %v39_v12 = vld [vmem:[#allocation3 + $0xd8] sm:$0xff]  ;;  %v38_v13 = vld [vmem:[#allocation3 + $0xc0] sm:$0xff]  ;;  %v37_v14 = vld [vmem:[#allocation3 + $0xa8] sm:$0xff] }
  0x12   :  { %364 = vmatpush3.msra.mxu0 %v44_v2  ;;  %399 = vmatpush3.msra.mxu1 %v135_v8  ;;  %v36_v15 = vld [vmem:[#allocation3 + $0x90] sm:$0xff]  ;;  %v35_v16 = vld [vmem:[#allocation3 + $0x78] sm:$0xff]  ;;  %v34_v17 = vld [vmem:[#allocation3 + $0x60] sm:$0xff] }
  0x13   :  { %365 = vmatprep.subr.mxu0 %v502_v0  ;;  %400 = vmatprep.subr.mxu1 %v502_v0  ;;  %v33_v18 = vld [vmem:[#allocation3 + $0x48] sm:$0xff]  ;;  %v32_v19 = vld [vmem:[#allocation3 + $0x30] sm:$0xff]  ;;  %v31_v20 = vld [vmem:[#allocation3 + $0x18] sm:$0xff] }
  0x14   :  { %366 = vmatpush3.msra.mxu0 %v43_v3  ;;  %401 = vmatpush3.msra.mxu1 %v134_v9  ;;  %v30_v21 = vld [vmem:[#allocation3] sm:$0xff]  ;;  %v132_v23 = vld [vmem:[#allocation3 + $0x110] sm:$0xff]  ;;  %v131_v24 = vld [vmem:[#allocation3 + $0xf8] sm:$0xff] }
  0x15   :  { %367 = vmatprep.subr.mxu0 %v502_v0  ;;  %402 = vmatprep.subr.mxu1 %v502_v0  ;;  %v130_v25 = vld [vmem:[#allocation3 + $0xe0] sm:$0xff]  ;;  %v129_v26 = vld [vmem:[#allocation3 + $0xc8] sm:$0xff]  ;;  %v128_v27 = vld [vmem:[#allocation3 + $0xb0] sm:$0xff] }
  0x16   :  { %368 = vmatpush3.msra.mxu0 %v42_v4  ;;  %403 = vmatpush3.msra.mxu1 %v133_v11  ;;  %v127_v28 = vld [vmem:[#allocation3 + $0x98] sm:$0xff]  ;;  %v126_v29 = vld [vmem:[#allocation3 + $0x80] sm:$0xff]  ;;  %v125_v30 = vld [vmem:[#allocation3 + $0x68] sm:$0xff] }
  0x17   :  { %369 = vmatprep.subr.mxu0 %v502_v0  ;;  %404 = vmatprep.subr.mxu1 %v502_v0  ;;  %v29_v22 = vld [vmem:[#allocation2] sm:$0xff]  ;;  %v124_v31 = vld [vmem:[#allocation3 + $0x50] sm:$0xff]  ;;  %v122_v33 = vld [vmem:[#allocation3 + $0x20] sm:$0xff] }
  0x18   :  { %370 = vmatpush3.msra.mxu0 %v41_v7  ;;  %405 = vmatpush3.msra.mxu1 %v132_v23  ;;  %v123_v32 = vld [vmem:[#allocation3 + $0x38] sm:$0xff]  ;;  %v121_v34 = vld [vmem:[#allocation3 + $0x8] sm:$0xff]  ;;  %v226_v36 = vld [vmem:[#allocation3 + $0x160] sm:$0xff] }
  0x19   :  { %371 = vmatprep.subr.mxu0 %v502_v0  ;;  %406 = vmatprep.subr.mxu1 %v502_v0  ;;  %v227_v35 = vld [vmem:[#allocation3 + $0x178] sm:$0xff]  ;;  %v225_v37 = vld [vmem:[#allocation3 + $0x148] sm:$0xff]  ;;  %v224_v38 = vld [vmem:[#allocation3 + $0x130] sm:$0xff] }
  0x1a   :  { %372 = vmatpush3.msra.mxu0 %v40_v10  ;;  %407 = vmatpush3.msra.mxu1 %v131_v24  ;;  %v46_v39 = vld [vmem:[#allocation3 + $0x180] ss:$0 sm:$0xff]  ;;  %v223_v47 = vld [vmem:[#allocation3 + $0x118] sm:$0xff]  ;;  %v221_v49 = vld [vmem:[#allocation3 + $0xe8] sm:$0xff] }
  0x1b   :  { %373 = vmatprep.subr.mxu0 %v502_v0  ;;  %408 = vmatprep.subr.mxu1 %v502_v0  ;;  %v222_v48 = vld [vmem:[#allocation3 + $0x100] sm:$0xff]  ;;  %v220_v50 = vld [vmem:[#allocation3 + $0xd0] sm:$0xff]  ;;  %v219_v51 = vld [vmem:[#allocation3 + $0xb8] sm:$0xff] }
  0x1c   :  { %374 = vmatpush3.msra.mxu0 %v39_v12  ;;  %409 = vmatpush3.msra.mxu1 %v130_v25  ;;  %v218_v52 = vld [vmem:[#allocation3 + $0xa0] sm:$0xff]  ;;  %v217_v53 = vld [vmem:[#allocation3 + $0x88] sm:$0xff]  ;;  %v216_v54 = vld [vmem:[#allocation3 + $0x70] sm:$0xff] }
  0x1d   :  { %375 = vmatprep.subr.mxu0 %v502_v0  ;;  %410 = vmatprep.subr.mxu1 %v502_v0  ;;  %v215_v55 = vld [vmem:[#allocation3 + $0x58] sm:$0xff]  ;;  %v214_v56 = vld [vmem:[#allocation3 + $0x40] sm:$0xff]  ;;  %v213_v57 = vld [vmem:[#allocation3 + $0x28] sm:$0xff] }
  0x1e   :  { %376 = vmatpush3.msra.mxu0 %v38_v13  ;;  %411 = vmatpush3.msra.mxu1 %v129_v26  ;;  %v212_v58 = vld [vmem:[#allocation3 + $0x10] sm:$0xff]  ;;  %v137_v59 = vld [vmem:[#allocation3 + $0x188] ss:$0 sm:$0xff] }
  0x1f   :  { %377 = vmatprep.subr.mxu0 %v502_v0  ;;  %412 = vmatprep.subr.mxu1 %v502_v0  ;;  %v228_v4 = vld [vmem:[#allocation3 + $0x190] ss:$0 sm:$0xff] }
  0x20   :  { %378 = vmatpush3.msra.mxu0 %v37_v14  ;;  %413 = vmatpush3.msra.mxu1 %v128_v27 }
  0x21   :  { %379 = vmatprep.subr.mxu0 %v502_v0  ;;  %414 = vmatprep.subr.mxu1 %v502_v0 }
  0x22   :  { %380 = vmatpush3.msra.mxu0 %v36_v15  ;;  %415 = vmatpush3.msra.mxu1 %v127_v28 }
  0x23   :  { %381 = vmatprep.subr.mxu0 %v502_v0  ;;  %416 = vmatprep.subr.mxu1 %v502_v0 }
  0x24   :  { %382 = vmatpush3.msra.mxu0 %v35_v16  ;;  %417 = vmatpush3.msra.mxu1 %v126_v29 }
  0x25   :  { %383 = vmatprep.subr.mxu0 %v502_v0  ;;  %418 = vmatprep.subr.mxu1 %v502_v0 }
  0x26   :  { %384 = vmatpush3.msra.mxu0 %v34_v17  ;;  %419 = vmatpush3.msra.mxu1 %v125_v30 }
  0x27   :  { %385 = vmatprep.subr.mxu0 %v502_v0  ;;  %420 = vmatprep.subr.mxu1 %v502_v0 }
  0x28   :  { %386 = vmatpush3.msra.mxu0 %v33_v18  ;;  %421 = vmatpush3.msra.mxu1 %v124_v31 }
  0x29   :  { %387 = vmatprep.subr.mxu0 %v502_v0  ;;  %422 = vmatprep.subr.mxu1 %v502_v0 }
  0x2a   :  { %388 = vmatpush3.msra.mxu0 %v32_v19  ;;  %423 = vmatpush3.msra.mxu1 %v123_v32 }
  0x2b   :  { %389 = vmatprep.subr.mxu0 %v502_v0  ;;  %424 = vmatprep.subr.mxu1 %v502_v0 }
  0x2c   :  { %390 = vmatpush3.msra.mxu0 %v31_v20  ;;  %425 = vmatpush3.msra.mxu1 %v122_v33 }
  0x2d   :  { %391 = vmatprep.subr.mxu0 %v502_v0  ;;  %426 = vmatprep.subr.mxu1 %v502_v0 }
  0x2e   :  { %392 = vmatpush3.msra.mxu0 %v30_v21  ;;  %427 = vmatpush3.msra.mxu1 %v121_v34 }
  0x2f   :  { %394 = vmatmul.mubr.f32.vlgmr.msra.gmra.mxu0 %v29_v22  ;;  %431 = vmatprep.subr.mxu0 %v502_v0 }
  0x30   :  { %463 = vmatprep.mubr.msk.f32.mxu0 %vm503_vm0, %v502_v0  ;;  %432 = vmatpush3.msra.mxu0 %v227_v35 }
  0x31   :  { %433 = vmatprep.subr.mxu0 %v502_v0 }
  0x32   :  { %434 = vmatpush3.msra.mxu0 %v226_v36 }
  0x33   :  { %435 = vmatprep.subr.mxu0 %v502_v0 }
  0x34   :  { %436 = vmatpush3.msra.mxu0 %v225_v37 }
  0x35   :  { %437 = vmatprep.subr.mxu0 %v502_v0 }
  0x36   :  { %438 = vmatpush3.msra.mxu0 %v224_v38 }
  0x37   :  { %439 = vmatprep.subr.mxu0 %v502_v0 }
  0x38   :  { %440 = vmatpush3.msra.mxu0 %v223_v47 }
  0x39   :  { %441 = vmatprep.subr.mxu0 %v502_v0 }
  0x3a   :  { %442 = vmatpush3.msra.mxu0 %v222_v48 }
  0x3b   :  { %443 = vmatprep.subr.mxu0 %v502_v0 }
  0x3c   :  { %444 = vmatpush3.msra.mxu0 %v221_v49 }
  0x3d   :  { %445 = vmatprep.subr.mxu0 %v502_v0 }
  0x3e   :  { %446 = vmatpush3.msra.mxu0 %v220_v50 }
  0x3f   :  { %447 = vmatprep.subr.mxu0 %v502_v0 }
  0x40   :  { %448 = vmatpush3.msra.mxu0 %v219_v51 }
  0x41   :  { %449 = vmatprep.subr.mxu0 %v502_v0 }
  0x42   :  { %450 = vmatpush3.msra.mxu0 %v218_v52 }
  0x43   :  { %451 = vmatprep.subr.mxu0 %v502_v0 }
  0x44   :  { %452 = vmatpush3.msra.mxu0 %v217_v53 }
  0x45   :  { %453 = vmatprep.subr.mxu0 %v502_v0 }
  0x46   :  { %454 = vmatpush3.msra.mxu0 %v216_v54 }
  0x47   :  { %455 = vmatprep.subr.mxu0 %v502_v0 }
  0x48   :  { %456 = vmatpush3.msra.mxu0 %v215_v55 }
  0x49   :  { %457 = vmatprep.subr.mxu0 %v502_v0 }
  0x4a   :  { %458 = vmatpush3.msra.mxu0 %v214_v56 }
  0x4b   :  { %459 = vmatprep.subr.mxu0 %v502_v0 }
  0x4c   :  { %460 = vmatpush3.msra.mxu0 %v213_v57 }
  0x4d   :  { %461 = vmatprep.subr.mxu0 %v502_v0 }
  0x4e   :  { %462 = vmatpush3.msra.mxu0 %v212_v58 }
  0xef   :  { %v113_v40 = vpop.f32.mrf.mxu0 }
  0xf0   :  { %v114_v41 = vadd.f32 %v113_v40, %v46_v39 }
  0xf1   :  { %v395_v42 = vpop.f32.mrf.mxu0 }
  0xf2   :  { %v117_v43 = vmul.f32 0.5, %v114_v41 }
  0xf4   :  { %471 = vtanh.f32 %v117_v43 }
 0x101   :  { %v472_v44 = vpop.eup %471 }
 0x102   :  { %v119_v45 = vmul.f32 0.5, %v472_v44 }
 0x104   :  { %v120_v46 = vadd.f32 0.5, %v119_v45 }
 0x106   :  { %429 = vmatmul.mubr.f32.vlgmr.msra.gmra.mxu1 %v120_v46 }
 0x1c6   :  { %v204_v60 = vpop.f32.mrf.mxu1 }
 0x1c7   :  { %v205_v61 = vadd.f32 %v204_v60, %v137_v59 }
 0x1c8   :  { %v430_v62 = vpop.f32.mrf.mxu1 }
 0x1c9   :  { %v208_v63 = vmul.f32 0.5, %v205_v61 }
 0x1cb   :  { %473 = vtanh.f32 %v208_v63 }
 0x1d8   :  { %v474_v1 = vpop.eup %473 }
 0x1d9   :  { %v210_v2 = vmul.f32 0.5, %v474_v1 }
 0x1db   :  { %v211_v3 = vadd.f32 0.5, %v210_v2 }
 0x1dd   :  { %464 = vmatmul.mubr.f32.vlgmr.msra.gmra.mxu0 %v211_v3 }
 0x29d   :  { %v295_v5 = vpop.f32.mrf.mxu0 }
 0x29e   :  { %v296_v6 = vadd.f32 %v295_v5, %v228_v4 }
 0x29f   :  { %v465_v7 = vpop.f32.mrf.mxu0 }
 0x2a0   :  { %v299_v8 = vmul.f32 0.5, %v296_v6 }
 0x2a2   :  { %475 = vtanh.f32 %v299_v8 }
 0x2af   :  { %v476_v9 = vpop.eup %475 }
 0x2b0   :  { %v301_v0 = vmul.f32 0.5, %v476_v9 }
 0x2b2   :  { %v302_v10 = vadd.f32 0.5, %v301_v0 }
 0x2b4   :  { %304 = vst.msk [vmem:[%s585_s2] sm:$0xff] %vm303_vm2, %v302_v10 }
 0x2b5   :  { %309 = vsyncpa [#allocation4], 1 }

</bundles_post_ra>
